<compile_context>
chip_gen: v5e
topology: v5e:2x2
jax: 0.10.0
libtpu: 0.0.40
codegen_flags: <defaults>
</compile_context>

<pallas_src>
from functools import partial

import numpy as np

import jax
import jax.numpy as jnp
from jax.experimental import pallas as pl
from jax.experimental.pallas import tpu as pltpu

KSIZE = 3  # conv1d kernel size (padding=1 -> 'same' length)


def _onedcnn_kernel(x_ref, halo_ref, w_ref, bias_ref, o_ref):
    """One (batch, lane-tile) grid step: conv1d(k=3,'same') + folded BN + ReLU.

    x_ref:    (C_in, TL)       f32   input tile (lane-dense)
    halo_ref: (C_in, 2)        f32   [left-neighbour col, right-neighbour col]
    w_ref:    (3, C_out, C_in) bf16  per-tap weights, BN scale folded in
    bias_ref: (C_out, 1)       f32   folded conv bias + BN shift
    o_ref:    (C_out, TL)      f32
    """
    xf = x_ref[...]                                   # f32 (C_in, TL)
    tl = xf.shape[-1]
    lane = jax.lax.broadcasted_iota(jnp.int32, xf.shape, dimension=1)

    x = xf.astype(jnp.bfloat16)

    # Center tap (k = 1).
    acc = jnp.dot(w_ref[1], x, preferred_element_type=jnp.float32)

    # Left tap (k = 0): x[p-1] at position p. roll(+1) wraps the last column
    # into position 0 -> replace column 0 with the left halo column.
    x_left = jnp.where(lane == 0, halo_ref[:, 0:1],
                       pltpu.roll(xf, shift=1, axis=1)).astype(jnp.bfloat16)
    acc = acc + jnp.dot(w_ref[0], x_left, preferred_element_type=jnp.float32)

    # Right tap (k = 2): x[p+1] at position p. roll(tl-1) == roll(-1); the
    # wrapped column lands at position tl-1 -> replace with the right halo.
    x_right = jnp.where(lane == tl - 1, halo_ref[:, 1:2],
                        pltpu.roll(xf, shift=tl - 1, axis=1)).astype(jnp.bfloat16)
    acc = acc + jnp.dot(w_ref[2], x_right, preferred_element_type=jnp.float32)

    o_ref[...] = jnp.maximum(acc + bias_ref[...], 0.0).astype(o_ref.dtype)


def _pick_lane_tile(lp, max_tl):
    """Largest lane-dense tile (<= max_tl) dividing the padded length lp."""
    if lp <= max_tl:
        return lp                       # single full-extent tile (lp % 128 == 0)
    start = max_tl - (max_tl % 128)
    for tl in range(start, 0, -128):
        if lp % tl == 0:
            return tl
    return 128


@partial(jax.jit, static_argnames=("max_tl",))
def onedcnn_forward(x, w, b, gamma, beta, running_mean, running_var,
                    eps=1e-5, max_tl=2048):
    """x: (N, C_in, L) float32. Returns (N, C_out, L) float32."""
    N, C_in, L = x.shape
    C_out, _, K = w.shape
    assert K == KSIZE, "kernel specialized for kernel_size=3"

    # ---- Fold BatchNorm (eval) into weights / bias (wrapper-side, free). ----
    inv_std = jax.lax.rsqrt(running_var + eps)
    scale = gamma * inv_std                                        # (C_out,)
    bias = ((b - running_mean) * scale + beta).reshape(C_out, 1)
    bias = bias.astype(jnp.float32)

    # (C_out, C_in, K) -> (K, C_out, C_in), BN scale folded, bf16 for the MXU.
    w_taps = (jnp.transpose(w, (2, 0, 1)) * scale[None, :, None]).astype(jnp.bfloat16)

    # ---- Pad L up to a multiple of 128 (lane-dense, unmasked stores). ----
    Lp = ((L + 127) // 128) * 128
    x_p = x if Lp == L else jnp.pad(x, ((0, 0), (0, 0), (0, Lp - L)))

    TL = _pick_lane_tile(Lp, max_tl)
    T = Lp // TL

    # ---- Tiny halo array: for each L-tile, its out-of-tile neighbour columns
    # (zeros at the true sequence ends -> exact 'same' conv padding). ----
    lidx = np.arange(T) * TL - 1                  # left neighbour of column t*TL
    ridx = np.arange(T) * TL + TL                 # right neighbour of col (t+1)*TL-1
    left = jnp.take(x_p, np.clip(lidx, 0, Lp - 1), axis=2)        # (N, C_in, T)
    left = jnp.where(jnp.asarray(lidx < 0)[None, None, :], 0.0, left)
    right = jnp.take(x_p, np.clip(ridx, 0, Lp - 1), axis=2)       # (N, C_in, T)
    right = jnp.where(jnp.asarray(ridx >= L)[None, None, :], 0.0, right)
    halo = jnp.transpose(jnp.stack([left, right], axis=-1), (0, 2, 1, 3))
    halo = halo.astype(jnp.float32)                                # (N, T, C_in, 2)

    out_p = pl.pallas_call(
        _onedcnn_kernel,
        out_shape=jax.ShapeDtypeStruct((N, C_out, Lp), jnp.float32),
        grid_spec=pl.GridSpec(
            grid=(N, T),
            in_specs=[
                pl.BlockSpec((None, C_in, TL), lambda n, l: (n, 0, l)),
                pl.BlockSpec((None, None, C_in, 2), lambda n, l: (n, l, 0, 0)),
                pl.BlockSpec((KSIZE, C_out, C_in), lambda n, l: (0, 0, 0)),
                pl.BlockSpec((C_out, 1), lambda n, l: (0, 0)),
            ],
            out_specs=pl.BlockSpec((None, C_out, TL), lambda n, l: (n, 0, l)),
        ),
        compiler_params=pltpu.CompilerParams(
            dimension_semantics=("parallel", "parallel"),
        ),
    )(x_p, halo, w_taps, bias)

    return out_p if Lp == L else out_p[:, :, :L]


def _reference(x, w, b, gamma, beta, running_mean, running_var, eps=1e-5):
    # Pure-JAX f32 reference: conv1d(pad=1) -> BN(eval) -> ReLU, NCL layout.
    y = jax.lax.conv_general_dilated(
        x, w, window_strides=(1,), padding=((1, 1),),
        dimension_numbers=("NCH", "OIH", "NCH"),
    ) + b[None, :, None]
    y = (y - running_mean[None, :, None]) * jax.lax.rsqrt(
        running_var + eps)[None, :, None] * gamma[None, :, None] \
        + beta[None, :, None]
    return jnp.maximum(y, 0.0)


if __name__ == "__main__":
    C_in, C_out = 64, 64  # module defaults: 64 channels in/out

    key = jax.random.PRNGKey(0)
    kx, kw, kb, kg, kbt = jax.random.split(key, 5)

    # Deterministic synthetic parameters (shapes from nn.Conv1d / nn.BatchNorm1d).
    w = jax.random.normal(kw, (C_out, C_in, KSIZE), dtype=jnp.float32) * 0.05
    b = jax.random.normal(kb, (C_out,), dtype=jnp.float32) * 0.05
    gamma = 1.0 + 0.1 * jax.random.normal(kg, (C_out,), dtype=jnp.float32)
    beta = 0.1 * jax.random.normal(kbt, (C_out,), dtype=jnp.float32)
    running_mean = jnp.zeros((C_out,), dtype=jnp.float32)
    running_var = jnp.ones((C_out,), dtype=jnp.float32)

    # (batch N, length L, max lane tile) — exercises: single full tile,
    # non-128 L (pad + tail slice), and multi-tile halos.
    cases = [(2, 128, 2048), (2, 100, 2048), (2, 512, 128)]
    for N, L, max_tl in cases:
        kx, sub = jax.random.split(kx)
        x = jax.random.normal(sub, (N, C_in, L), dtype=jnp.float32)
        out = onedcnn_forward(x, w, b, gamma, beta, running_mean, running_var,
                              max_tl=max_tl)
        out = jax.block_until_ready(out)
        ref = _reference(x, w, b, gamma, beta, running_mean, running_var)
        assert out.shape == (N, C_out, L)
        # bf16 MXU operands -> loosen tolerance vs the f32 reference.
        assert jnp.allclose(out, ref, atol=2e-2, rtol=2e-2), \
            f"mismatch vs reference at N={N}, L={L}, max_tl={max_tl}"

    print("KERNEL_OK")
</pallas_src>

<mosaic_0001>
module attributes {stable_mosaic.version = 11 : i64} {
  func.func @_onedcnn_kernel(%arg0: i32, %arg1: i32, %arg2: memref<1x64x128xf32, #tpu.memory_space<vmem>>, %arg3: memref<1x1x64x2xf32, #tpu.memory_space<vmem>>, %arg4: memref<3x64x64xbf16, #tpu.memory_space<vmem>>, %arg5: memref<64x1xf32, #tpu.memory_space<vmem>>, %arg6: memref<1x64x128xf32, #tpu.memory_space<vmem>>) attributes {dimension_semantics = [#tpu.dimension_semantics<parallel>, #tpu.dimension_semantics<parallel>], iteration_bounds = array<i64: 2, 1>, scalar_prefetch = 0 : i64, scratch_operands = 0 : i64, tpu.core_type = #tpu.core_type<tc>, window_params = [{transform_indices = @transform_0, window_bounds = array<i64: 1, 64, 128>}, {transform_indices = @transform_1, window_bounds = array<i64: 1, 1, 64, 2>}, {pipeline_mode = #tpu.pipeline_mode<synchronous>, transform_indices = @transform_2, window_bounds = array<i64: 3, 64, 64>}, {pipeline_mode = #tpu.pipeline_mode<synchronous>, transform_indices = @transform_3, window_bounds = array<i64: 64, 1>}, {transform_indices = @transform_4, window_bounds = array<i64: 1, 64, 128>}]} {
    %c0 = arith.constant 0 : index
    %c0_0 = arith.constant 0 : index
    %c0_1 = arith.constant 0 : index
    %0 = vector.load %arg2[%c0, %c0_0, %c0_1] : memref<1x64x128xf32, #tpu.memory_space<vmem>>, vector<1x64x128xf32>
    %1 = vector.shape_cast %0 : vector<1x64x128xf32> to vector<64x128xf32>
    %2 = tpu.iota {dimensions = array<i32: 1>} : vector<64x128xi32>
    %3 = arith.truncf %1 : vector<64x128xf32> to vector<64x128xbf16>
    %c1 = arith.constant 1 : index
    %c0_2 = arith.constant 0 : index
    %c0_3 = arith.constant 0 : index
    %4 = vector.load %arg4[%c1, %c0_2, %c0_3] : memref<3x64x64xbf16, #tpu.memory_space<vmem>>, vector<1x64x64xbf16>
    %5 = vector.shape_cast %4 : vector<1x64x64xbf16> to vector<64x64xbf16>
    %cst = arith.constant dense<0.000000e+00> : vector<64x128xf32>
    %6 = tpu.matmul %5, %3, %cst {dimension_numbers = #tpu.dot_dimension_numbers<[1], [0], [0], [1], [0, 0, 1, 1], [], []>} : vector<64x64xbf16>, vector<64x128xbf16>, vector<64x128xf32> -> vector<64x128xf32>
    %c0_i32 = arith.constant 0 : i32
    %7 = vector.broadcast %c0_i32 : i32 to vector<64x128xi32>
    %8 = arith.cmpi eq, %2, %7 : vector<64x128xi32>
    %c0_4 = arith.constant 0 : index
    %c0_5 = arith.constant 0 : index
    %c0_6 = arith.constant 0 : index
    %c0_7 = arith.constant 0 : index
    %9 = vector.load %arg3[%c0_4, %c0_5, %c0_6, %c0_7] : memref<1x1x64x2xf32, #tpu.memory_space<vmem>>, vector<1x1x64x1xf32>
    %10 = vector.shape_cast %9 : vector<1x1x64x1xf32> to vector<64x1xf32>
    %c1_i32 = arith.constant 1 : i32
    %11 = tpu.dynamic_rotate %1 by %c1_i32 dim 1 : vector<64x128xf32>, i32 -> vector<64x128xf32>
    %12 = vector.shape_cast %10 : vector<64x1xf32> to vector<64x1xf32>
    %13 = vector.broadcast %12 : vector<64x1xf32> to vector<64x128xf32>
    %14 = arith.select %8, %13, %11 : vector<64x128xi1>, vector<64x128xf32>
    %15 = arith.truncf %14 : vector<64x128xf32> to vector<64x128xbf16>
    %c0_8 = arith.constant 0 : index
    %c0_9 = arith.constant 0 : index
    %c0_10 = arith.constant 0 : index
    %16 = vector.load %arg4[%c0_8, %c0_9, %c0_10] : memref<3x64x64xbf16, #tpu.memory_space<vmem>>, vector<1x64x64xbf16>
    %17 = vector.shape_cast %16 : vector<1x64x64xbf16> to vector<64x64xbf16>
    %cst_11 = arith.constant dense<0.000000e+00> : vector<64x128xf32>
    %18 = tpu.matmul %17, %15, %cst_11 {dimension_numbers = #tpu.dot_dimension_numbers<[1], [0], [0], [1], [0, 0, 1, 1], [], []>} : vector<64x64xbf16>, vector<64x128xbf16>, vector<64x128xf32> -> vector<64x128xf32>
    %19 = arith.addf %6, %18 : vector<64x128xf32>
    %c127_i32 = arith.constant 127 : i32
    %20 = vector.broadcast %c127_i32 : i32 to vector<64x128xi32>
    %21 = arith.cmpi eq, %2, %20 : vector<64x128xi32>
    %c0_12 = arith.constant 0 : index
    %c0_13 = arith.constant 0 : index
    %c0_14 = arith.constant 0 : index
    %c1_15 = arith.constant 1 : index
    %22 = vector.load %arg3[%c0_12, %c0_13, %c0_14, %c1_15] : memref<1x1x64x2xf32, #tpu.memory_space<vmem>>, vector<1x1x64x1xf32>
    %23 = vector.shape_cast %22 : vector<1x1x64x1xf32> to vector<64x1xf32>
    %c127_i32_16 = arith.constant 127 : i32
    %24 = tpu.dynamic_rotate %1 by %c127_i32_16 dim 1 : vector<64x128xf32>, i32 -> vector<64x128xf32>
    %25 = vector.shape_cast %23 : vector<64x1xf32> to vector<64x1xf32>
    %26 = vector.broadcast %25 : vector<64x1xf32> to vector<64x128xf32>
    %27 = arith.select %21, %26, %24 : vector<64x128xi1>, vector<64x128xf32>
    %28 = arith.truncf %27 : vector<64x128xf32> to vector<64x128xbf16>
    %c2 = arith.constant 2 : index
    %c0_17 = arith.constant 0 : index
    %c0_18 = arith.constant 0 : index
    %29 = vector.load %arg4[%c2, %c0_17, %c0_18] : memref<3x64x64xbf16, #tpu.memory_space<vmem>>, vector<1x64x64xbf16>
    %30 = vector.shape_cast %29 : vector<1x64x64xbf16> to vector<64x64xbf16>
    %cst_19 = arith.constant dense<0.000000e+00> : vector<64x128xf32>
    %31 = tpu.matmul %30, %28, %cst_19 {dimension_numbers = #tpu.dot_dimension_numbers<[1], [0], [0], [1], [0, 0, 1, 1], [], []>} : vector<64x64xbf16>, vector<64x128xbf16>, vector<64x128xf32> -> vector<64x128xf32>
    %32 = arith.addf %19, %31 : vector<64x128xf32>
    %c0_20 = arith.constant 0 : index
    %c0_21 = arith.constant 0 : index
    %33 = vector.load %arg5[%c0_20, %c0_21] : memref<64x1xf32, #tpu.memory_space<vmem>>, vector<64x1xf32>
    %34 = vector.broadcast %33 : vector<64x1xf32> to vector<64x128xf32>
    %35 = arith.addf %32, %34 : vector<64x128xf32>
    %cst_22 = arith.constant 0.000000e+00 : f32
    %36 = vector.broadcast %cst_22 : f32 to vector<64x128xf32>
    %37 = arith.maximumf %35, %36 : vector<64x128xf32>
    %c0_23 = arith.constant 0 : index
    %c0_24 = arith.constant 0 : index
    %c0_25 = arith.constant 0 : index
    %38 = vector.load %arg6[%c0_23, %c0_24, %c0_25] : memref<1x64x128xf32, #tpu.memory_space<vmem>>, vector<1x64x128xf32>
    %39 = vector.shape_cast %38 : vector<1x64x128xf32> to vector<64x128xf32>
    %40 = vector.shape_cast %37 : vector<64x128xf32> to vector<1x64x128xf32>
    tpu.vector_store %arg6[%c0_23, %c0_24, %c0_25], %40 {strides = array<i32>} : memref<1x64x128xf32, #tpu.memory_space<vmem>>, vector<1x64x128xf32>,
    return
  }
  func.func @transform_0(%arg0: i32, %arg1: i32) -> (i32, i32, i32) {
    %c0_i32 = arith.constant 0 : i32
    %c0_i32_0 = arith.constant 0 : i32
    return %arg0, %c0_i32, %arg1 : i32, i32, i32
  }
  func.func @transform_1(%arg0: i32, %arg1: i32) -> (i32, i32, i32, i32) {
    %c0_i32 = arith.constant 0 : i32
    %c0_i32_0 = arith.constant 0 : i32
    %c0_i32_1 = arith.constant 0 : i32
    return %arg0, %arg1, %c0_i32, %c0_i32_0 : i32, i32, i32, i32
  }
  func.func @transform_2(%arg0: i32, %arg1: i32) -> (i32, i32, i32) {
    %c0_i32 = arith.constant 0 : i32
    %c0_i32_0 = arith.constant 0 : i32
    %c0_i32_1 = arith.constant 0 : i32
    %c0_i32_2 = arith.constant 0 : i32
    return %c0_i32, %c0_i32_0, %c0_i32_1 : i32, i32, i32
  }
  func.func @transform_3(%arg0: i32, %arg1: i32) -> (i32, i32) {
    %c0_i32 = arith.constant 0 : i32
    %c0_i32_0 = arith.constant 0 : i32
    %c0_i32_1 = arith.constant 0 : i32
    return %c0_i32, %c0_i32_0 : i32, i32
  }
  func.func @transform_4(%arg0: i32, %arg1: i32) -> (i32, i32, i32) {
    %c0_i32 = arith.constant 0 : i32
    %c0_i32_0 = arith.constant 0 : i32
    return %arg0, %c0_i32, %arg1 : i32, i32, i32
  }
}

</mosaic_0001>

<bundles_post_ra>
// kernel: onedcnn_forward.1
= control target key start
LH: loop header
LB: loop body
LE: loop exit
PB: predicated region body
PF: predicated region fallthrough
CT: control target
= control target key end

     0   :  { %9 = vsyncpa [#allocation3], 0  ;;  %s1469_s0 = inlined_call_operand.vmem [shape: f32[2,64,128], index: 0, kind: input, shape index: {}]   ;;  %s1470_s1 = inlined_call_operand.vmem [shape: f32[2,1,64,2], index: 1, kind: input, shape index: {}]   ;;  %s1471_s2 = inlined_call_operand.vmem [shape: bf16[3,64,64], index: 2, kind: input, shape index: {}]   ;;  %s1472_s3 = inlined_call_operand.vmem [shape: f32[64,1], index: 3, kind: input, shape index: {}]   ;;  %s1473_s4 = inlined_call_operand.hbm [shape: f32[2,64,128], index: 4, kind: output, shape index: {}]  }
   0x1   :  { %11 = vsyncpa [#allocation3 + $0x1], 0  ;;  %s1194_s15 = smov 0   ;;  %s1196_s16 = smov 0  }
   0x2   :  { %s1198_s17 = smov 0   ;;  %s1200_s18 = smov 0  }
   0x3   :  { %s1202_s19 = smov 0   ;;  %s1204_s20 = smov 0  }
   0x4 LB: > { %s814_s21 = sadd.s32 4294967295, %s1161_s20   ;;  %s815_s22 = sadd.s32 4294967294, %s1161_s20   ;;  %s1161_s20 = sphi %s1204_s20, %s17_s20   ;;  %s1157_s19 = sphi %s1202_s19, %s1480_s19   ;;  %s1153_s18 = sphi %s1200_s18, %s1479_s18   ;;  %s1149_s17 = sphi %s1198_s17, %s1478_s17   ;;  %s1145_s16 = sphi %s1196_s16, %s1477_s16   ;;  %s1141_s15 = sphi %s1194_s15, %s1476_s15  }
   0x5   : > { %s29_s23 = sadd.s32 1, %s1157_s19  ;;  %s136_s24 = sadd.s32 1, %s1149_s17 }
   0x6   : > { %p31_p0 = scmp.ge.s32.totalorder %s29_s23, 2  ;;  %p146_p1 = scmp.ne.s32.totalorder %s1149_s17, %s1145_s16 }
   0x7   : > { %p147_p2 = scmp.eq.s32.totalorder %s814_s21, 1  ;;  %p152_p3 = scmp.ne.s32.totalorder %s1145_s16, %s1141_s15 }
   0x8   : > { %s1482_s23 = smov (%p31_p0, %s29_s23), 0  ;;  %p153_p5 = scmp.eq.s32.totalorder %s815_s22, 1 }
   0x9   : > { %p1234_p4 = por %p147_p2, %p146_p1  ;;  %s131_s26 = ssub.s32 %s1157_s19, %s1482_s23 }
   0xa   : > { %p818_p6 = scmp.ge.s32.totalorder %s1161_s20, 1  ;;  %p134_p7 = scmp.eq.s32.totalorder %s131_s26, 0 }
   0xb   : > { %p1241_p8 = por %p153_p5, %p152_p3  ;;  %p200_p9 = scmp.lt.s32.totalorder %s1161_s20, 3 }
   0xc   : > { %s1247_s28 = scalar_select %p134_p7, %s1149_s17, %s136_s24  }
   0xd   : > { %p201_p10 = pnand %p818_p6, %p200_p9 }
   0xe   : > { %p238_p11 = scmp.lt.s32.totalorder (!%p201_p10), %s1153_s18, 1  ;;  %s1165_s11 = smov (!%p201_p10), 127  }
   0xf   : > { %204 = sbr.rel (%p201_p10) target bundleno = 372 (0x174), region = 36  ;;  %s1166_s12 = smov (!%p201_p10), 1  }
  0x10   : > { %s235_s5 = sand.u32 (!%p201_p10), 1, %s1145_s16   ;;  %s919_s8 = sshll.u32 (!%p201_p10), %s1153_s18, 6 }
  0x11   : > { %s819_s6 = sshll.u32 (!%p201_p10), %s235_s5, 6  ;;  %s1103_s26 = scalar_lea.hbm (!%p201_p10), %s1473_s4, 128 }
  0x14   : > { %v1163_v0 = vmov 1   ;;  %v1164_v1 = vmov 0   ;;  %s239_s29 = scalar_select %p238_p11, %s1153_s18, 1  ;;  %v627_v26 = vld [vmem:[%s1472_s3 + $0x8] sm:$0xff]  ;;  %v629_v27 = vld [vmem:[%s1472_s3 + $0x18] sm:$0xff]  ;;  %v632_v28 = vld [vmem:[%s1472_s3 + $0x30] sm:$0xff]  ;;  %v264_v34 = vlaneseq }
  0x15   : > { %1009 = vset.pattern.permute.xlu1 %v1163_v0  ;;  %998 = vset.pattern.permute.xlu0 %v1164_v1  ;;  %v908_v58 = vld [vmem:[%s1471_s2 + $0x28] sm:$0xff]  ;;  %vm384_vm2 = vcmask 523264   ;;  %s699_s18 = scalar_lea.sflag [#allocation3], %s235_s5 }
  0x16   : > { %1020 = vset.pattern.permute.xlu2 %v1164_v1  ;;  %s905_s30 = sshll.u32 %s239_s29, 6  ;;  %v1300_v36 = vand.u32 127, %v264_v34 }
  0x17   : > { %s1254_s7 = scalar_lea.vmem %s1469_s0, %s905_s30  ;;  %s1261_s10 = scalar_lea.vmem %s1470_s1, %s905_s30 }
  0x18   : > { %v262_v2 = vld [vmem:[%s1254_s7 + $0x30] sm:$0xff]  ;;  %v263_v3 = vld [vmem:[%s1254_s7 + $0x38] sm:$0xff]  ;;  %v260_v5 = vld [vmem:[%s1254_s7 + $0x20] sm:$0xff]  ;;  %vm487_vm0 = vcmp.eq.s32.totalorder %v1300_v36, 127  ;;  %vm279_vm1 = vcmp.eq.s32.totalorder %v1300_v36, 0 }
  0x19   : > { %v1004_v4 = vpack.i.bf16 %v263_v3, %v262_v2  ;;  %v261_v6 = vld [vmem:[%s1254_s7 + $0x28] sm:$0xff]  ;;  %v286_v8 = vld [vmem:[%s1261_s10 + $0x30] sm:$0xff]  ;;  %v287_v9 = vld [vmem:[%s1261_s10 + $0x38] sm:$0xff]  ;;  %v1294_v31 = vpack.c.bf16 %v263_v3, %v262_v2 }
  0x1a   : > { %v1015_v7 = vpack.i.bf16 %v261_v6, %v260_v5  ;;  %v284_v10 = vld [vmem:[%s1261_s10 + $0x20] sm:$0xff]  ;;  %v285_v11 = vld [vmem:[%s1261_s10 + $0x28] sm:$0xff]  ;;  %v1010_v12 = vpack.i.bf16 %v287_v9, %v286_v8  ;;  %v258_v14 = vld [vmem:[%s1254_s7 + $0x10] sm:$0xff]  ;;  %v1297_v35 = vpack.c.bf16 %v261_v6, %v260_v5 }
  0x1b   : > { %1005 = vrot.lane.b32.xlu1 %v1004_v4, %s1165_s11  ;;  %994 = vrot.lane.b32.xlu0 %v1004_v4, %s1166_s12  ;;  %v1021_v13 = vpack.i.bf16 %v285_v11, %v284_v10  ;;  %v259_v15 = vld [vmem:[%s1254_s7 + $0x18] sm:$0xff]  ;;  %v282_v17 = vld [vmem:[%s1261_s10 + $0x10] sm:$0xff] }
  0x1c   : > { %1016 = vrot.lane.b32.xlu2 %v1015_v7, %s1166_s12  ;;  %v1037_v16 = vpack.i.bf16 %v259_v15, %v258_v14  ;;  %v283_v18 = vld [vmem:[%s1261_s10 + $0x18] sm:$0xff]  ;;  %v256_v20 = vld [vmem:[%s1254_s7] sm:$0xff]  ;;  %v257_v21 = vld [vmem:[%s1254_s7 + $0x8] sm:$0xff]  ;;  %924 = vmatpush.bf16.msra.mxu1 %v1294_v31  ;;  %v1302_v38 = vpack.c.bf16 %v259_v15, %v258_v14  ;;  %s1420_s7 = scalar_lea.vmem [#allocation2], %s819_s6 }
  0x1d   : > { %v1043_v19 = vpack.i.bf16 %v283_v18, %v282_v17  ;;  %v1059_v22 = vpack.i.bf16 %v257_v21, %v256_v20  ;;  %v280_v23 = vld [vmem:[%s1261_s10] sm:$0xff]  ;;  %v281_v24 = vld [vmem:[%s1261_s10 + $0x8] sm:$0xff]  ;;  %v1307_v53 = vpack.c.bf16 %v257_v21, %v256_v20  ;;  %v628_v36 = vld [vmem:[%s1472_s3 + $0x10] sm:$0xff] }
  0x1e   : > { %v1065_v25 = vpack.i.bf16 %v281_v24, %v280_v23 }
  0x20   : > { %925 = vmatpush.bf16.msra.mxu1 %v1297_v35 }
  0x23   : > { %1011 = vperm.xlu1 %1009, %v1010_v12   ;;  %1000 = vperm.xlu0 %998, %v1010_v12  }
  0x24   : > { %1022 = vperm.xlu2 %1020, %v1021_v13   ;;  %926 = vmatpush.bf16.msra.mxu1 %v1302_v38 }
  0x28   : > { %927 = vmatpush.bf16.msra.mxu1 %v1307_v53 }
  0x2b   : > { %1027 = vrot.lane.b32.xlu1 %v1015_v7, %s1165_s11  ;;  %1038 = vrot.lane.b32.xlu0 %v1037_v16, %s1166_s12 }
  0x2c   : > { %1042 = vset.pattern.permute.xlu1 %v1164_v1  ;;  %1053 = vset.pattern.permute.xlu0 %v1163_v0 }
  0x2d   : > { %1031 = vset.pattern.permute.xlu2 %v1163_v0  ;;  %869 = vmatmul.msk.bf16.vlgmr.msra.gmra.mxu1 %vm384_vm2, %v908_v58  ;;  %v915_v58 = vld [vmem:[%s1471_s2 + $0x40] sm:$0xff] }
  0x2e   : > { %1033 = vperm.xlu2 %1031, %v1021_v13  }
  0x33   : > { %1044 = vperm.xlu1 %1042, %v1043_v19   ;;  %1055 = vperm.xlu0 %1053, %v1043_v19  }
  0x36   : > { %1049 = vrot.lane.b32.xlu2 %v1037_v16, %s1165_s11 }
  0x37   : > { %1064 = vset.pattern.permute.xlu2 %v1164_v1 }
  0x3b   : > { %1060 = vrot.lane.b32.xlu1 %v1059_v22, %s1166_s12  ;;  %1081 = vset.pattern.permute.xlu0 %v1164_v1  ;;  %s712_s12 = sshll.u32 %s1420_s7, 4  ;;  %s713_s12 = int_to_ptr.vmem [resolvable:$true] %s712_s12 }
  0x3e   : > { %1066 = vperm.xlu2 %1064, %v1065_v25  }
  0x43   : > { %1071 = vrot.lane.b32.xlu1 %v1059_v22, %s1165_s11  ;;  %s711_s11 = scalar_lea.hbm %s1473_s4, %s919_s8 }
  0x44   : > { %s714_s13 = sshll.u32 %s711_s11, 4  ;;  %s715_s13 = int_to_ptr.hbm [resolvable:$true] %s714_s13 }
  0x45   : > { %s1097_s14 = sshra.s32 %s715_s13, 4  ;;  %s1098_s14 = int_to_ptr.hbm [resolvable:$true] %s1097_s14 }
  0x46   : > { %1075 = vset.pattern.permute.xlu2 %v1163_v0  ;;  %s1099_s21 = scalar_lea.hbm %s1098_s14, 64  ;;  %p1104_p1 = scmp.lt.s32.totalorder %s1098_s14, %s1473_s4 }
  0x47   : > { %1077 = vperm.xlu2 %1075, %v1065_v25   ;;  %p1100_p12 = scmp.ne.s32.totalorder %s1098_s14, %s1099_s21  ;;  %p1105_p2 = scmp.lt.s32.totalorder %s1103_s26, %s1099_s21 }
  0x49   : > { %p1101_p13 = pnand %p1100_p12, %p1234_p4  ;;  %p1106_p3 = por %p1105_p2, %p1104_p1 }
  0x4b   : > { %641 = vperm.xlu1 %1042, %v627_v26   ;;  %p1102_p0 = pneg %p1101_p13 }
  0x4d   : > { %p1107_p5 = pnand %p1106_p3, %p1102_p0 }
  0x4f   : > { %1082 = vset.pattern.permute.xlu2 %v1164_v1 }
  0x50   : > { %646 = vperm.xlu2 %1082, %v628_v36  }
  0x53   : > { %651 = vperm.xlu1 %1042, %v629_v27   ;;  %v909_v27 = vld [vmem:[%s1471_s2 + $0x30] sm:$0xff] }
  0x54   : > { %870 = vmatmul.msk.bf16.gmra.mxu1 %vm384_vm2, %v909_v27 }
  0x5b   : > { %666 = vperm.xlu1 %1042, %v632_v28  }
  0x76   : > { %v1017_v29 = vpop.permute.xlu2 %1016 }
  0x77   : > { %v1019_v39 = vunpack.i.h.bf16 %v1017_v29  ;;  %v1018_v40 = vunpack.i.l.bf16 %v1017_v29 }
  0x7e   : > { %v1023_v30 = vpop.permute.xlu2 %1022 }
  0x7f   : > { %v1025_v43 = vunpack.i.h.bf16 %v1023_v30  ;;  %v1024_v44 = vunpack.i.l.bf16 %v1023_v30 }
  0x81   : > { %v348_v61 = vsel %vm279_vm1, %v1024_v44, %v1018_v40  ;;  %v349_v62 = vsel %vm279_vm1, %v1025_v43, %v1019_v39 }
  0x82   : > { %v354_v4 = vpack.c.bf16 %v349_v62, %v348_v61 }
  0x88   : > { %v1034_v37 = vpop.permute.xlu2 %1033 }
  0x89   : > { %v1036_v63 = vunpack.i.h.bf16 %v1034_v37  ;;  %v1035_v0 = vunpack.i.l.bf16 %v1034_v37 }
  0x8d   : > { %v1006_v32 = vpop.permute.xlu1 %1005  ;;  %v995_v33 = vpop.permute.xlu0 %994 }
  0x8e   : > { %v997_v41 = vunpack.i.h.bf16 %v995_v33  ;;  %v996_v42 = vunpack.i.l.bf16 %v995_v33  ;;  %v1008_v45 = vunpack.i.h.bf16 %v1006_v32  ;;  %v1007_v46 = vunpack.i.l.bf16 %v1006_v32 }
  0x90   : > { %v1050_v1 = vpop.permute.xlu2 %1049 }
  0x91   : > { %v1052_v12 = vunpack.i.h.bf16 %v1050_v1  ;;  %v1051_v13 = vunpack.i.l.bf16 %v1050_v1 }
  0x95   : > { %v1012_v47 = vpop.permute.xlu1 %1011  ;;  %v1001_v48 = vpop.permute.xlu0 %1000 }
  0x96   : > { %v1014_v49 = vunpack.i.h.bf16 %v1012_v47  ;;  %v1013_v50 = vunpack.i.l.bf16 %v1012_v47  ;;  %v1003_v51 = vunpack.i.h.bf16 %v1001_v48  ;;  %v1002_v52 = vunpack.i.l.bf16 %v1001_v48 }
  0x98   : > { %v350_v54 = vsel %vm279_vm1, %v1002_v52, %v996_v42  ;;  %v351_v55 = vsel %vm279_vm1, %v1003_v51, %v997_v41  ;;  %v542_v56 = vsel %vm487_vm0, %v1013_v50, %v1007_v46  ;;  %v543_v57 = vsel %vm487_vm0, %v1014_v49, %v1008_v45  ;;  %v1067_v20 = vpop.permute.xlu2 %1066  ;;  %v911_v41 = vld [vmem:[%s1471_s2] sm:$0xff]  ;;  %v912_v42 = vld [vmem:[%s1471_s2 + $0x8] sm:$0xff] }
  0x99   : > { %v355_v59 = vpack.c.bf16 %v351_v55, %v350_v54  ;;  %v1320_v60 = vpack.c.bf16 %v543_v57, %v542_v56  ;;  %v1069_v28 = vunpack.i.h.bf16 %v1067_v20  ;;  %v1068_v29 = vunpack.i.l.bf16 %v1067_v20  ;;  %v916_v51 = vld [vmem:[%s1471_s2 + $0x48] sm:$0xff]  ;;  %v907_v52 = vld [vmem:[%s1471_s2 + $0x20] sm:$0xff]  ;;  %v633_v56 = vld [vmem:[%s1472_s3 + $0x38] sm:$0xff] }
  0x9a   : > { %v631_v54 = vld [vmem:[%s1472_s3 + $0x28] sm:$0xff]  ;;  %v630_v55 = vld [vmem:[%s1472_s3 + $0x20] sm:$0xff]  ;;  %v914_v57 = vld [vmem:[%s1471_s2 + $0x18] sm:$0xff] }
  0x9b   : > { %401 = vmatpush.bf16.msra.mxu0 %v355_v59  ;;  %920 = vmatpush.bf16.msra.mxu3 %v355_v59  ;;  %v918_v59 = vld [vmem:[%s1471_s2 + $0x58] sm:$0xff] }
  0x9c   : > { %928 = vmatpush.bf16.msra.mxu2 %v1320_v60  ;;  %656 = vperm.xlu2 %1082, %v630_v55  }
  0x9d   : > { %v1028_v2 = vpop.permute.xlu1 %1027  ;;  %v1039_v3 = vpop.permute.xlu0 %1038 }
  0x9e   : > { %v1030_v5 = vunpack.i.h.bf16 %v1028_v2  ;;  %v1029_v6 = vunpack.i.l.bf16 %v1028_v2  ;;  %v1041_v10 = vunpack.i.h.bf16 %v1039_v3  ;;  %v1040_v11 = vunpack.i.l.bf16 %v1039_v3 }
  0x9f   : > { %402 = vmatpush.bf16.msra.mxu0 %v354_v4  ;;  %921 = vmatpush.bf16.msra.mxu3 %v354_v4 }
  0xa0   : > { %v540_v7 = vsel %vm487_vm0, %v1035_v0, %v1029_v6  ;;  %v541_v8 = vsel %vm487_vm0, %v1036_v63, %v1030_v5 }
  0xa1   : > { %v1333_v9 = vpack.c.bf16 %v541_v8, %v540_v7  ;;  %v1078_v40 = vpop.permute.xlu2 %1077 }
  0xa2   : > { %v1080_v43 = vunpack.i.h.bf16 %v1078_v40  ;;  %v1079_v44 = vunpack.i.l.bf16 %v1078_v40 }
  0xa3   : > { %929 = vmatpush.bf16.msra.mxu2 %v1333_v9 }
  0xa4   : > { %671 = vperm.xlu2 %1082, %v633_v56  }
  0xa5   : > { %v1045_v14 = vpop.permute.xlu1 %1044  ;;  %v1056_v15 = vpop.permute.xlu0 %1055 }
  0xa6   : > { %v1047_v16 = vunpack.i.h.bf16 %v1045_v14  ;;  %v1046_v17 = vunpack.i.l.bf16 %v1045_v14  ;;  %v1058_v18 = vunpack.i.h.bf16 %v1056_v15  ;;  %v1057_v19 = vunpack.i.l.bf16 %v1056_v15 }
  0xa8   : > { %v346_v21 = vsel %vm279_vm1, %v1046_v17, %v1040_v11  ;;  %v347_v22 = vsel %vm279_vm1, %v1047_v16, %v1041_v10  ;;  %v538_v23 = vsel %vm487_vm0, %v1057_v19, %v1051_v13  ;;  %v539_v24 = vsel %vm487_vm0, %v1058_v18, %v1052_v12 }
  0xa9   : > { %v353_v25 = vpack.c.bf16 %v347_v22, %v346_v21  ;;  %v545_v26 = vpack.c.bf16 %v539_v24, %v538_v23 }
  0xaa   : > { %v472_v61 = vpop.f32.mrf.mxu1  ;;  %v647_v3 = vpop.permute.xlu2 %646 }
  0xab   : > { %403 = vmatpush.bf16.msra.mxu0 %v353_v25  ;;  %922 = vmatpush.bf16.msra.mxu3 %v353_v25 }
  0xac   : > { %930 = vmatpush.bf16.msra.mxu2 %v545_v26 }
  0xad   : > { %v1061_v30 = vpop.permute.xlu1 %1060 }
  0xae   : > { %v1063_v32 = vunpack.i.h.bf16 %v1061_v30  ;;  %v1062_v33 = vunpack.i.l.bf16 %v1061_v30 }
  0xb0   : > { %v344_v34 = vsel %vm279_vm1, %v1068_v29, %v1062_v33  ;;  %v345_v37 = vsel %vm279_vm1, %v1069_v28, %v1063_v32 }
  0xb1   : > { %v352_v39 = vpack.c.bf16 %v345_v37, %v344_v34 }
  0xb2   : > { %v474_v1 = vpop.f32.mrf.mxu1 }
  0xb3   : > { %404 = vmatpush.bf16.msra.mxu0 %v352_v39  ;;  %923 = vmatpush.bf16.msra.mxu3 %v352_v39 }
  0xb5   : > { %v1072_v45 = vpop.permute.xlu1 %1071 }
  0xb6   : > { %v1074_v46 = vunpack.i.h.bf16 %v1072_v45  ;;  %v1073_v47 = vunpack.i.l.bf16 %v1072_v45  ;;  %848 = vmatmul.msk.bf16.vlgmr.msra.gmra.mxu0 %vm384_vm2, %v911_v41  ;;  %849 = vmatmul.msk.bf16.vlgmr.msra.gmra.mxu3 %vm384_vm2, %v912_v42 }
  0xb7   : > { %462 = vmatpush.bf16.msrb.mxu0 %v1294_v31  ;;  %v910_v31 = vld [vmem:[%s1471_s2 + $0x38] sm:$0xff] }
  0xb8   : > { %v536_v48 = vsel %vm487_vm0, %v1079_v44, %v1073_v47  ;;  %v537_v49 = vsel %vm487_vm0, %v1080_v43, %v1074_v46  ;;  %871 = vmatmul.msk.bf16.gmra.mxu1 %vm384_vm2, %v910_v31 }
  0xb9   : > { %v544_v50 = vpack.c.bf16 %v537_v49, %v536_v48 }
  0xbb   : > { %463 = vmatpush.bf16.msrb.mxu0 %v1297_v35  ;;  %931 = vmatpush.bf16.msra.mxu2 %v544_v50  ;;  %v626_v35 = vld [vmem:[%s1472_s3] sm:$0xff] }
  0xbc   : > { %636 = vperm.xlu0 %1081, %v626_v35  }
  0xbd   : > { %v642_v2 = vpop.permute.xlu1 %641 }
  0xbe   : > { %897 = vmatmul.msk.bf16.vlgmr.msra.gmra.mxu2 %vm384_vm2, %v916_v51 }
  0xbf   : > { %464 = vmatpush.bf16.msrb.mxu0 %v1302_v38  ;;  %v913_v38 = vld [vmem:[%s1471_s2 + $0x10] sm:$0xff] }
  0xc3   : > { %465 = vmatpush.bf16.msrb.mxu0 %v1307_v53  ;;  %v917_v53 = vld [vmem:[%s1471_s2 + $0x50] sm:$0xff] }
  0xc4   : > { %661 = vperm.xlu0 %1081, %v631_v54  }
  0xc5   : > { %v652_v15 = vpop.permute.xlu1 %651 }
  0xc6   : > { %850 = vmatmul.msk.bf16.gmra.mxu3 %vm384_vm2, %v913_v38  ;;  %868 = vmatmul.msk.bf16.vlgmr.msrb.gmra.mxu0 %vm384_vm2, %v907_v52 }
  0xc7   : > { %593 = vmatpush.bf16.msra.mxu0 %v1320_v60 }
  0xcb   : > { %594 = vmatpush.bf16.msra.mxu0 %v1333_v9 }
  0xcd   : > { %v667_v35 = vpop.permute.xlu1 %666 }
  0xce   : > { %898 = vmatmul.msk.bf16.gmra.mxu2 %vm384_vm2, %v917_v53 }
  0xcf   : > { %595 = vmatpush.bf16.msra.mxu0 %v545_v26 }
  0xd1   : > { %v477_v11 = vpop.f32.mrf.mxu1 }
  0xd3   : > { %596 = vmatpush.bf16.msra.mxu0 %v544_v50 }
  0xd6   : > { %851 = vmatmul.msk.bf16.gmra.mxu3 %vm384_vm2, %v914_v57  ;;  %896 = vmatmul.msk.bf16.vlgmr.msra.gmra.mxu0 %vm384_vm2, %v915_v58 }
  0xd9   : > { %v479_v26 = vpop.f32.mrf.mxu1 }
  0xde   : > { %899 = vmatmul.msk.bf16.gmra.mxu2 %vm384_vm2, %v918_v59 }
  0xf6   : > { %v657_v21 = vpop.permute.xlu2 %656 }
  0xfe   : > { %v672_v57 = vpop.permute.xlu2 %671 }
 0x12e   : > { %v637_v20 = vpop.permute.xlu0 %636 }
 0x133   : > { %v406_v60 = vpop.f32.mrf.mxu0 }
 0x135   : > { %v482_v46 = vpop.f32.mrf.mxu1 }
 0x136   : > { %v662_v39 = vpop.permute.xlu0 %661 }
 0x139   : > { %v411_v62 = vpop.f32.mrf.mxu3 }
 0x13a   : > { %v473_v0 = vadd.f32 %v472_v61, %v411_v62 }
 0x13b   : > { %v408_v63 = vpop.f32.mrf.mxu0 }
 0x13d   : > { %v484_v54 = vpop.f32.mrf.mxu1 }
 0x141   : > { %v413_v4 = vpop.f32.mrf.mxu3  ;;  %v603_v5 = vpop.f32.mrf.mxu2 }
 0x142   : > { %v620_v6 = vadd.f32 %v603_v5, %v473_v0  ;;  %v475_v10 = vadd.f32 %v474_v1, %v413_v4 }
 0x143   : > { %v467_v7 = vpop.f32.mrf.mxu0 }
 0x144   : > { %v676_v8 = vadd.f32 %v647_v3, %v620_v6  ;;  %v468_v24 = vadd.f32 %v467_v7, %v406_v60 }
 0x146   : > { %v684_v9 = vmax.f32 %v676_v8, 0.0 }
 0x148   : > { %692 = vst [vmem:[%s1420_s7 + $0x10] sm:$0xff] %v684_v9 }
 0x149   : > { %v416_v12 = vpop.f32.mrf.mxu3  ;;  %v605_v13 = vpop.f32.mrf.mxu2 }
 0x14a   : > { %v621_v14 = vadd.f32 %v605_v13, %v475_v10  ;;  %v478_v18 = vadd.f32 %v477_v11, %v416_v12 }
 0x14b   : > { %v469_v16 = vpop.f32.mrf.mxu0 }
 0x14c   : > { %v677_v17 = vadd.f32 %v652_v15, %v621_v14  ;;  %v470_v40 = vadd.f32 %v469_v16, %v408_v63 }
 0x14e   : > { %v685_v19 = vmax.f32 %v677_v17, 0.0 }
 0x150   : > { %693 = vst [vmem:[%s1420_s7 + $0x18] sm:$0xff] %v685_v19 }
 0x151   : > { %v418_v22 = vpop.f32.mrf.mxu3  ;;  %v608_v23 = vpop.f32.mrf.mxu2 }
 0x152   : > { %v622_v25 = vadd.f32 %v608_v23, %v478_v18  ;;  %v480_v33 = vadd.f32 %v479_v26, %v418_v22 }
 0x153   : > { %v598_v27 = vpop.f32.mrf.mxu0 }
 0x154   : > { %v678_v28 = vadd.f32 %v657_v21, %v622_v25  ;;  %v618_v29 = vadd.f32 %v598_v27, %v468_v24 }
 0x156   : > { %v686_v30 = vmax.f32 %v678_v28, 0.0  ;;  %v674_v32 = vadd.f32 %v637_v20, %v618_v29 }
 0x158   : > { %694 = vst [vmem:[%s1420_s7 + $0x20] sm:$0xff] %v686_v30  ;;  %v682_v34 = vmax.f32 %v674_v32, 0.0 }
 0x159   : > { %v610_v37 = vpop.f32.mrf.mxu2  ;;  %v421_v42 = vpop.f32.mrf.mxu3 }
 0x15a   : > { %690 = vst [vmem:[%s1420_s7] sm:$0xff] %v682_v34  ;;  %v623_v41 = vadd.f32 %v610_v37, %v480_v33  ;;  %v483_v47 = vadd.f32 %v482_v46, %v421_v42 }
 0x15b   : > { %v600_v43 = vpop.f32.mrf.mxu0 }
 0x15c   : > { %v679_v44 = vadd.f32 %v662_v39, %v623_v41  ;;  %v619_v45 = vadd.f32 %v600_v43, %v470_v40 }
 0x15e   : > { %v687_v48 = vmax.f32 %v679_v44, 0.0  ;;  %v675_v49 = vadd.f32 %v642_v2, %v619_v45 }
 0x160   : > { %695 = vst [vmem:[%s1420_s7 + $0x28] sm:$0xff] %v687_v48  ;;  %v683_v31 = vmax.f32 %v675_v49, 0.0 }
 0x161   : > { %v613_v50 = vpop.f32.mrf.mxu2  ;;  %v423_v38 = vpop.f32.mrf.mxu3 }
 0x162   : > { %691 = vst [vmem:[%s1420_s7 + $0x8] sm:$0xff] %v683_v31  ;;  %v624_v51 = vadd.f32 %v613_v50, %v483_v47  ;;  %v485_v55 = vadd.f32 %v484_v54, %v423_v38 }
 0x164   : > { %v680_v36 = vadd.f32 %v667_v35, %v624_v51 }
 0x166   : > { %v688_v52 = vmax.f32 %v680_v36, 0.0 }
 0x168   : > { %696 = vst [vmem:[%s1420_s7 + $0x30] sm:$0xff] %v688_v52 }
 0x169   : > { %v615_v53 = vpop.f32.mrf.mxu2 }
 0x16a   : > { %v625_v56 = vadd.f32 %v615_v53, %v485_v55 }
 0x16c   : > { %v681_v58 = vadd.f32 %v672_v57, %v625_v56 }
 0x16e   : > { %v689_v59 = vmax.f32 %v681_v58, 0.0 }
 0x170   : > { %697 = vst [vmem:[%s1420_s7 + $0x38] sm:$0xff] %v689_v59 }
 0x171   : > { %1110 = shalt.err (!%p1107_p5)
}
 0x172   : > { %s1167_s5 = smov 128   ;;  %s1168_s6 = smov 8  }
 0x173   : > { %932 = dma.vmem_to_hbm [thread:$0]  (%p1234_p4), %s713_s12, 1024, %s715_s13, %s699_s18, %s1167_s5, %s1167_s5, %s1168_s6  }
 0x174 PF: > { %p938_p6 = scmp.ge.s32.totalorder %s1161_s20, 2  ;;  %s729_s7 = sand.u32 1, %s1141_s15  }
 0x175   : > { %s730_s8 = scalar_lea.sflag [#allocation3], %s729_s7 }
 0x176   : > { %p935_p7 = pnand %p938_p6, %p1241_p8 }
 0x178   : > { %p936_p9 = pneg %p935_p7 }
 0x17a   : > { %1136 = dma.done.wait (%p936_p9), %s730_s8, 1024  }
 0x17b   : > { %1138 = vsyncadd (%p936_p9), %s730_s8, 4294966272  ;;  %s17_s20 = sadd.s32 1, %s1161_s20   ;;  %s1476_s15 = smov %s1145_s16 }
 0x17c   : > { %p14_p10 = scmp.ge.s32.totalorder %s17_s20, 4   ;;  %s1477_s16 = smov %s1149_s17 }
 0x17d   : > { %s1478_s17 = smov %s1247_s28  ;;  %s1479_s18 = smov %s1157_s19 }
 0x17e   : > { %s1480_s19 = smov %s1482_s23  ;;  %16 = sbr.rel (!%p14_p10) target bundleno = 4 (0x4), region = 76 }
 0x183   :  { %736 = vsyncpa [#allocation3], 1 }
 0x184   :  { %738 = vsyncpa [#allocation3 + $0x1], 1 }

</bundles_post_ra>
